<compile_context>
chip_gen: v7x
topology: tpu7x:2x2x1
jax: 0.10.0
libtpu: 0.0.40
codegen_flags: <defaults>
</compile_context>

<pallas_src>
import math
import functools

import jax
import jax.numpy as jnp
from jax import lax
from jax.experimental import pallas as pl
from jax.experimental.pallas import tpu as pltpu

NEG_INF = -1e30  # large finite negative: bf16-safe, no inf/nan arithmetic


# ---------------------------------------------------------------------------
# Kernel 1: fused QKV projection -> lane-dense (B, T, C) q / k / v.
# ---------------------------------------------------------------------------
def qkv_proj_kernel(x_ref, wqkv_ref, bqkv_ref, q_ref, k_ref, v_ref, *, scale):
    """x_ref: (Tr, C); wqkv_ref: (C, 3C) = [Wq|Wk|Wv]; bqkv_ref: (1, 3C) f32.

    Writes q (pre-scaled by 1/sqrt(hd)), k, v as full-width lane-dense (Tr, C)
    slabs -- no per-head slicing / masked stores in this kernel.
    """
    qkv = jnp.dot(x_ref[...], wqkv_ref[...],
                  preferred_element_type=jnp.float32) + bqkv_ref[...]
    c = q_ref.shape[-1]
    q_ref[...] = (qkv[:, :c] * scale).astype(q_ref.dtype)
    k_ref[...] = qkv[:, c:2 * c].astype(k_ref.dtype)
    v_ref[...] = qkv[:, 2 * c:].astype(v_ref.dtype)


# ---------------------------------------------------------------------------
# Kernel 2: flash attention (online softmax) + fused output projection.
# ---------------------------------------------------------------------------
def flash_attn_kernel(q_ref, k_ref, v_ref, wp_ref, bp_ref, o_ref,
                      m_scr, l_scr, acc_scr):
    """Grid = (batch, q_tiles, kv_tiles); kv is the sequential reduction axis.

    q_ref: (Tq, C)   k_ref/v_ref: (Tk, C)   wp_ref: (H, hd, C)   bp_ref: (1, C)
    o_ref: (Tq, C)
    m_scr/l_scr: (H, Tq, 1) f32    acc_scr: (H, Tq, hd) f32
    """
    n_head, head_dim, _ = wp_ref.shape
    t_q = q_ref.shape[0]
    t_k = k_ref.shape[0]
    qi = pl.program_id(1)
    kvi = pl.program_id(2)
    q_start = qi * t_q
    k_start = kvi * t_k

    @pl.when(kvi == 0)
    def _init():
        m_scr[...] = jnp.full(m_scr.shape, NEG_INF, jnp.float32)
        l_scr[...] = jnp.zeros(l_scr.shape, jnp.float32)
        acc_scr[...] = jnp.zeros(acc_scr.shape, jnp.float32)

    def online_softmax_step(apply_mask):
        if apply_mask:  # one mask per tile, shared by all heads
            row = q_start + lax.broadcasted_iota(jnp.int32, (t_q, t_k), 0)
            col = k_start + lax.broadcasted_iota(jnp.int32, (t_q, t_k), 1)
            keep = col <= row
        for h in range(n_head):  # static per-head slices at the MXU boundary
            lo = h * head_dim
            hi = lo + head_dim
            # q was pre-scaled by 1/sqrt(hd) in kernel 1.
            s = jnp.einsum('qd,kd->qk', q_ref[:, lo:hi], k_ref[:, lo:hi],
                           preferred_element_type=jnp.float32)       # (Tq, Tk)
            if apply_mask:
                s = jnp.where(keep, s, NEG_INF)
            m_prev = m_scr[h]                                         # (Tq, 1)
            m_new = jnp.maximum(m_prev, jnp.max(s, axis=-1, keepdims=True))
            alpha = jnp.exp(m_prev - m_new)
            p = jnp.exp(s - m_new)                                    # f32
            l_scr[h] = alpha * l_scr[h] + jnp.sum(p, axis=-1, keepdims=True)
            acc_scr[h] = alpha * acc_scr[h] + jnp.dot(
                p.astype(v_ref.dtype), v_ref[:, lo:hi],
                preferred_element_type=jnp.float32)
            m_scr[h] = m_new

    # Tile straddles the diagonal: build + apply the causal mask.
    @pl.when(jnp.logical_and(k_start < q_start + t_q,
                             k_start + t_k - 1 > q_start))
    def _diagonal_tile():
        online_softmax_step(apply_mask=True)

    # Tile entirely below the diagonal: no mask work at all.
    @pl.when(k_start + t_k - 1 <= q_start)
    def _unmasked_tile():
        online_softmax_step(apply_mask=False)

    # Fully-masked (future) tiles run neither branch; their K/V HBM fetch is
    # also skipped by the clamped kv index_map in the wrapper.

    @pl.when(kvi == pl.num_programs(2) - 1)
    def _finalize():
        inv_l = pl.reciprocal(l_scr[...])                             # (H, Tq, 1)
        out = jnp.zeros((t_q, o_ref.shape[-1]), jnp.float32)
        # Output projection straight from the per-head accumulator: no repack.
        for h in range(n_head):
            y_h = (acc_scr[h] * inv_l[h]).astype(wp_ref.dtype)        # (Tq, hd)
            out = out + jnp.dot(y_h, wp_ref[h],
                                preferred_element_type=jnp.float32)
        o_ref[...] = (out + bp_ref[...]).astype(o_ref.dtype)


# ---------------------------------------------------------------------------
# Host-side wrapper.
# ---------------------------------------------------------------------------
def _pick_tile(t, target=256):
    """Largest multiple of 128 dividing t and <= target (v6e/v7x MXU is 256
    wide; v5e is fine with 128); falls back to the full extent."""
    best = None
    cand = 128
    while cand <= min(t, target):
        if t % cand == 0:
            best = cand
        cand += 128
    return best if best is not None else t


def _block_vmem_bytes(shape, dtype, buffers=2):
    """Approximate padded VMEM footprint of one (double-buffered) block."""
    itemsize = jnp.dtype(dtype).itemsize
    dims = list(shape)
    dims[-1] = -(-dims[-1] // 128) * 128
    if len(dims) >= 2:
        sub = 8 * max(1, 4 // itemsize)           # bf16 packs 2 rows / sublane
        dims[-2] = -(-dims[-2] // sub) * sub
    n = 1
    for d in dims:
        n *= d
    return n * itemsize * buffers


def _vmem_limit(nbytes):
    """Explicit scoped-VMEM limit: actual footprint + headroom, >= 32 MiB."""
    return int(min(max(int(nbytes * 1.5) + (4 << 20), 32 << 20), 100 << 20))


def multi_head_attention(x, params, n_head, *, compute_dtype=jnp.bfloat16,
                         q_tile=None, kv_tile=None, row_tile=None):
    """Causal multi-head self-attention (eval mode).  x: (B, T, C)."""
    B, T, C = x.shape
    assert C % n_head == 0
    hd = C // n_head
    scale = 1.0 / math.sqrt(hd)

    q_tile = _pick_tile(T) if q_tile is None else q_tile
    kv_tile = _pick_tile(T) if kv_tile is None else kv_tile
    row_tile = _pick_tile(T) if row_tile is None else row_tile
    assert T % q_tile == 0 and T % kv_tile == 0 and T % row_tile == 0

    # Fused, pre-transposed (in, out) QKV weight; biases stay f32 (added after
    # the f32-accumulated matmul).  wp is reshaped head-major so the output
    # projection can consume the (H, Tq, hd) accumulator without a repack.
    wqkv = jnp.concatenate([params["wq"], params["wk"], params["wv"]],
                           axis=1).astype(compute_dtype)              # (C, 3C)
    bqkv = jnp.concatenate([params["bq"], params["bk"], params["bv"]], axis=1)
    wp = params["wp"].astype(compute_dtype).reshape(n_head, hd, C)    # (H, hd, C)
    bp = params["bp"]                                                 # (1, C) f32
    x_c = x.astype(compute_dtype)

    # ---- Kernel 1: fused QKV projection -> lane-dense (B, T, C) q/k/v ------
    vmem1 = (_block_vmem_bytes((row_tile, C), compute_dtype)          # x block
             + _block_vmem_bytes((C, 3 * C), compute_dtype)           # wqkv
             + _block_vmem_bytes((1, 3 * C), jnp.float32)             # bqkv
             + 3 * _block_vmem_bytes((row_tile, C), compute_dtype))   # q,k,v
    qkv_struct = jax.ShapeDtypeStruct((B, T, C), compute_dtype)
    row_block = pl.BlockSpec((None, row_tile, C), lambda b, r: (b, r, 0))
    q, k, v = pl.pallas_call(
        functools.partial(qkv_proj_kernel, scale=scale),
        out_shape=(qkv_struct, qkv_struct, qkv_struct),
        grid_spec=pltpu.PrefetchScalarGridSpec(
            num_scalar_prefetch=0,
            grid=(B, T // row_tile),
            in_specs=[
                pl.BlockSpec((None, row_tile, C), lambda b, r: (b, r, 0)),
                pl.BlockSpec((C, 3 * C), lambda b, r: (0, 0)),
                pl.BlockSpec((1, 3 * C), lambda b, r: (0, 0)),
            ],
            out_specs=(row_block, row_block, row_block),
        ),
        compiler_params=pltpu.CompilerParams(
            dimension_semantics=("parallel", "parallel"),
            vmem_limit_bytes=_vmem_limit(vmem1)),
    )(x_c, wqkv, bqkv)

    # ---- Kernel 2: flash attention + fused output projection ---------------
    def kv_index_map(b, qi, ki):
        # Clamp to the last kv block holding any unmasked column for this q
        # tile: fully-masked (future) tiles alias the previous block index, so
        # Pallas skips their HBM fetch entirely (compute is pl.when-gated).
        last_useful = ((qi + 1) * q_tile - 1) // kv_tile
        return (b, jnp.minimum(ki, last_useful), 0)

    vmem2 = (_block_vmem_bytes((q_tile, C), compute_dtype)            # q block
             + 2 * _block_vmem_bytes((kv_tile, C), compute_dtype)     # k, v
             + _block_vmem_bytes((n_head, hd, C), compute_dtype)      # wp
             + _block_vmem_bytes((1, C), jnp.float32)                 # bp
             + _block_vmem_bytes((q_tile, C), x.dtype)                # out
             + 2 * _block_vmem_bytes((n_head, q_tile, 1), jnp.float32,
                                     buffers=1)                       # m, l
             + _block_vmem_bytes((n_head, q_tile, hd), jnp.float32,
                                 buffers=1))                          # acc
    return pl.pallas_call(
        flash_attn_kernel,
        out_shape=jax.ShapeDtypeStruct((B, T, C), x.dtype),
        grid_spec=pltpu.PrefetchScalarGridSpec(
            num_scalar_prefetch=0,
            grid=(B, T // q_tile, T // kv_tile),
            in_specs=[
                pl.BlockSpec((None, q_tile, C), lambda b, qi, ki: (b, qi, 0)),
                pl.BlockSpec((None, kv_tile, C), kv_index_map),
                pl.BlockSpec((None, kv_tile, C), kv_index_map),
                pl.BlockSpec((n_head, hd, C), lambda b, qi, ki: (0, 0, 0)),
                pl.BlockSpec((1, C), lambda b, qi, ki: (0, 0)),
            ],
            out_specs=pl.BlockSpec((None, q_tile, C),
                                   lambda b, qi, ki: (b, qi, 0)),
            scratch_shapes=[
                pltpu.VMEM((n_head, q_tile, 1), jnp.float32),   # running max
                pltpu.VMEM((n_head, q_tile, 1), jnp.float32),   # running denom
                pltpu.VMEM((n_head, q_tile, hd), jnp.float32),  # running numer
            ],
        ),
        compiler_params=pltpu.CompilerParams(
            dimension_semantics=("parallel", "parallel", "arbitrary"),
            vmem_limit_bytes=_vmem_limit(vmem2)),
    )(q, k, v, wp, bp)


# ---------------------------------------------------------------------------
# Pure-JAX reference + params (mirrors the PyTorch module in eval mode).
# ---------------------------------------------------------------------------
def reference_mha(x, params, n_head):
    B, T, C = x.shape
    hd = C // n_head

    def lin(t, w, b):
        return t @ w + b[0]

    q = lin(x, params["wq"], params["bq"]).reshape(B, T, n_head, hd).transpose(0, 2, 1, 3)
    k = lin(x, params["wk"], params["bk"]).reshape(B, T, n_head, hd).transpose(0, 2, 1, 3)
    v = lin(x, params["wv"], params["bv"]).reshape(B, T, n_head, hd).transpose(0, 2, 1, 3)
    att = jnp.einsum("bhqd,bhkd->bhqk", q, k) / math.sqrt(hd)
    mask = jnp.tril(jnp.ones((T, T), dtype=bool))
    att = jnp.where(mask[None, None], att, -jnp.inf)
    att = jax.nn.softmax(att, axis=-1)
    y = jnp.einsum("bhqk,bhkd->bhqd", att, v)
    y = y.transpose(0, 2, 1, 3).reshape(B, T, C)
    return lin(y, params["wp"], params["bp"])


def init_params(key, n_embd):
    """Deterministic init mimicking nn.Linear defaults (uniform +-1/sqrt(in))."""
    keys = jax.random.split(key, 8)
    bound = 1.0 / math.sqrt(n_embd)
    p = {}
    for i, n in enumerate(["q", "k", "v", "p"]):
        # Pre-transposed: (in, out), so kernels compute x @ W.
        p["w" + n] = jax.random.uniform(keys[2 * i], (n_embd, n_embd),
                                        jnp.float32, -bound, bound)
        p["b" + n] = jax.random.uniform(keys[2 * i + 1], (1, n_embd),
                                        jnp.float32, -bound, bound)
    return p


if __name__ == "__main__":
    # hd = 32; q_tile = kv_tile = 64 exercises a fully-unmasked tile, a
    # diagonal tile, and a fully-masked tile whose K/V DMA is clamp-skipped.
    B, T, C, n_head = 2, 128, 128, 4

    key = jax.random.PRNGKey(0)
    k_x, k_p = jax.random.split(key)
    x = jax.random.normal(k_x, (B, T, C), jnp.float32)
    params = init_params(k_p, C)
    ref = reference_mha(x, params, n_head)

    # f32 compute path (tighter check of the kernel math / masking).
    out_f32 = jax.block_until_ready(
        multi_head_attention(x, params, n_head, compute_dtype=jnp.float32,
                             q_tile=64, kv_tile=64, row_tile=64))
    assert out_f32.shape == (B, T, C)
    err_f32 = float(jnp.max(jnp.abs(out_f32 - ref)))
    assert err_f32 < 2e-2, f"f32 max abs err {err_f32}"

    # Default path: bf16 MXU inputs, f32 accumulation / softmax, default tiles.
    out_bf16 = jax.block_until_ready(multi_head_attention(x, params, n_head))
    assert out_bf16.shape == (B, T, C)
    err_bf16 = float(jnp.max(jnp.abs(out_bf16 - ref)))
    assert err_bf16 < 2.5e-1, f"bf16 max abs err {err_bf16}"

    print("KERNEL_OK")
</pallas_src>

<mosaic_0001>
module attributes {stable_mosaic.version = 11 : i64} {
  func.func @qkv_proj_kernel(%arg0: i32, %arg1: i32, %arg2: memref<1x64x128xf32, #tpu.memory_space<vmem>>, %arg3: memref<128x384xf32, #tpu.memory_space<vmem>>, %arg4: memref<1x384xf32, #tpu.memory_space<vmem>>, %arg5: memref<1x64x128xf32, #tpu.memory_space<vmem>>, %arg6: memref<1x64x128xf32, #tpu.memory_space<vmem>>, %arg7: memref<1x64x128xf32, #tpu.memory_space<vmem>>) attributes {dimension_semantics = [#tpu.dimension_semantics<parallel>, #tpu.dimension_semantics<parallel>], iteration_bounds = array<i64: 2, 2>, scalar_prefetch = 0 : i64, scratch_operands = 0 : i64, tpu.core_type = #tpu.core_type<tc>, window_params = [{transform_indices = @transform_0, window_bounds = array<i64: 1, 64, 128>}, {pipeline_mode = #tpu.pipeline_mode<synchronous>, transform_indices = @transform_1, window_bounds = array<i64: 128, 384>}, {pipeline_mode = #tpu.pipeline_mode<synchronous>, transform_indices = @transform_2, window_bounds = array<i64: 1, 384>}, {transform_indices = @transform_3, window_bounds = array<i64: 1, 64, 128>}, {transform_indices = @transform_4, window_bounds = array<i64: 1, 64, 128>}, {transform_indices = @transform_5, window_bounds = array<i64: 1, 64, 128>}]} {
    %c0 = arith.constant 0 : index
    %c0_0 = arith.constant 0 : index
    %c0_1 = arith.constant 0 : index
    %0 = vector.load %arg2[%c0, %c0_0, %c0_1] : memref<1x64x128xf32, #tpu.memory_space<vmem>>, vector<1x64x128xf32>
    %1 = vector.shape_cast %0 : vector<1x64x128xf32> to vector<64x128xf32>
    %c0_2 = arith.constant 0 : index
    %c0_3 = arith.constant 0 : index
    %2 = vector.load %arg3[%c0_2, %c0_3] : memref<128x384xf32, #tpu.memory_space<vmem>>, vector<128x384xf32>
    %cst = arith.constant dense<0.000000e+00> : vector<64x384xf32>
    %3 = tpu.matmul %1, %2, %cst {dimension_numbers = #tpu.dot_dimension_numbers<[1], [0], [0], [1], [0, 0, 1, 1], [], []>} : vector<64x128xf32>, vector<128x384xf32>, vector<64x384xf32> -> vector<64x384xf32>
    %c0_4 = arith.constant 0 : index
    %c0_5 = arith.constant 0 : index
    %4 = vector.load %arg4[%c0_4, %c0_5] : memref<1x384xf32, #tpu.memory_space<vmem>>, vector<1x384xf32>
    %5 = vector.broadcast %4 : vector<1x384xf32> to vector<64x384xf32>
    %6 = arith.addf %3, %5 : vector<64x384xf32>
    %7 = vector.extract_strided_slice %6 {offsets = [0, 0], sizes = [64, 128], strides = [1, 1]} : vector<64x384xf32> to vector<64x128xf32>
    %cst_6 = arith.constant 0.176776692 : f32
    %8 = vector.broadcast %cst_6 : f32 to vector<64x128xf32>
    %9 = arith.mulf %7, %8 : vector<64x128xf32>
    %c0_7 = arith.constant 0 : index
    %c0_8 = arith.constant 0 : index
    %c0_9 = arith.constant 0 : index
    %10 = vector.load %arg5[%c0_7, %c0_8, %c0_9] : memref<1x64x128xf32, #tpu.memory_space<vmem>>, vector<1x64x128xf32>
    %11 = vector.shape_cast %10 : vector<1x64x128xf32> to vector<64x128xf32>
    %12 = vector.shape_cast %9 : vector<64x128xf32> to vector<1x64x128xf32>
    tpu.vector_store %arg5[%c0_7, %c0_8, %c0_9], %12 {strides = array<i32>} : memref<1x64x128xf32, #tpu.memory_space<vmem>>, vector<1x64x128xf32>,
    %13 = vector.extract_strided_slice %6 {offsets = [0, 128], sizes = [64, 128], strides = [1, 1]} : vector<64x384xf32> to vector<64x128xf32>
    %c0_10 = arith.constant 0 : index
    %c0_11 = arith.constant 0 : index
    %c0_12 = arith.constant 0 : index
    %14 = vector.load %arg6[%c0_10, %c0_11, %c0_12] : memref<1x64x128xf32, #tpu.memory_space<vmem>>, vector<1x64x128xf32>
    %15 = vector.shape_cast %14 : vector<1x64x128xf32> to vector<64x128xf32>
    %16 = vector.shape_cast %13 : vector<64x128xf32> to vector<1x64x128xf32>
    tpu.vector_store %arg6[%c0_10, %c0_11, %c0_12], %16 {strides = array<i32>} : memref<1x64x128xf32, #tpu.memory_space<vmem>>, vector<1x64x128xf32>,
    %17 = vector.extract_strided_slice %6 {offsets = [0, 256], sizes = [64, 128], strides = [1, 1]} : vector<64x384xf32> to vector<64x128xf32>
    %c0_13 = arith.constant 0 : index
    %c0_14 = arith.constant 0 : index
    %c0_15 = arith.constant 0 : index
    %18 = vector.load %arg7[%c0_13, %c0_14, %c0_15] : memref<1x64x128xf32, #tpu.memory_space<vmem>>, vector<1x64x128xf32>
    %19 = vector.shape_cast %18 : vector<1x64x128xf32> to vector<64x128xf32>
    %20 = vector.shape_cast %17 : vector<64x128xf32> to vector<1x64x128xf32>
    tpu.vector_store %arg7[%c0_13, %c0_14, %c0_15], %20 {strides = array<i32>} : memref<1x64x128xf32, #tpu.memory_space<vmem>>, vector<1x64x128xf32>,
    return
  }
  func.func @transform_0(%arg0: i32, %arg1: i32) -> (i32, i32, i32) {
    %c0_i32 = arith.constant 0 : i32
    %c0_i32_0 = arith.constant 0 : i32
    return %arg0, %arg1, %c0_i32 : i32, i32, i32
  }
  func.func @transform_1(%arg0: i32, %arg1: i32) -> (i32, i32) {
    %c0_i32 = arith.constant 0 : i32
    %c0_i32_0 = arith.constant 0 : i32
    %c0_i32_1 = arith.constant 0 : i32
    return %c0_i32, %c0_i32_0 : i32, i32
  }
  func.func @transform_2(%arg0: i32, %arg1: i32) -> (i32, i32) {
    %c0_i32 = arith.constant 0 : i32
    %c0_i32_0 = arith.constant 0 : i32
    %c0_i32_1 = arith.constant 0 : i32
    return %c0_i32, %c0_i32_0 : i32, i32
  }
  func.func @transform_3(%arg0: i32, %arg1: i32) -> (i32, i32, i32) {
    %c0_i32 = arith.constant 0 : i32
    %c0_i32_0 = arith.constant 0 : i32
    return %arg0, %arg1, %c0_i32 : i32, i32, i32
  }
  func.func @transform_4(%arg0: i32, %arg1: i32) -> (i32, i32, i32) {
    %c0_i32 = arith.constant 0 : i32
    %c0_i32_0 = arith.constant 0 : i32
    return %arg0, %arg1, %c0_i32 : i32, i32, i32
  }
  func.func @transform_5(%arg0: i32, %arg1: i32) -> (i32, i32, i32) {
    %c0_i32 = arith.constant 0 : i32
    %c0_i32_0 = arith.constant 0 : i32
    return %arg0, %arg1, %c0_i32 : i32, i32, i32
  }
}

</mosaic_0001>

<bundles_post_ra>
// kernel: tpu_custom_call.1
= control target key start
LH: loop header
LB: loop body
LE: loop exit
PB: predicated region body
PF: predicated region fallthrough
CT: control target
= control target key end

     0   :  { %s1778_s0 = inlined_call_operand.hbm [shape: f32[2,128,128], index: 0, kind: input, shape index: {}]   ;;  %s1779_s1 = inlined_call_operand.hbm [shape: f32[128,384], index: 1, kind: input, shape index: {}]   ;;  %s1780_s2 = inlined_call_operand.vmem [shape: f32[1,384], index: 2, kind: input, shape index: {}]   ;;  %s1781_s3 = inlined_call_operand.hbm [shape: f32[2,128,128], index: 3, kind: output, shape index: {0}]   ;;  %s1782_s4 = inlined_call_operand.hbm [shape: f32[2,128,128], index: 4, kind: output, shape index: {1}]   ;;  %s1783_s5 = inlined_call_operand.hbm [shape: f32[2,128,128], index: 5, kind: output, shape index: {2}]  }
   0x1   :  { %1794 = sst [smem:[#allocation20_spill]] %s1779_s1 }
   0x2   :  { %1795 = sst [smem:[#allocation21_spill]] %s1783_s5 }
   0x3   :  { %11 = vsyncpa [#allocation3], 0 }
   0x4   :  { %13 = vsyncpa [#allocation3 + $0x1], 0 }
   0x5   :  { %14 = vsyncpa [#allocation6], 0 }
   0x6   :  { %15 = vsyncpa [#allocation4], 0 }
   0x7   :  { %17 = vsyncpa [#allocation4 + $0x1], 0 }
   0x8   :  { %18 = vsyncpa [#allocation9], 0 }
   0x9   :  { %20 = vsyncpa [#allocation9 + $0x1], 0  ;;  %s1385_s18 = smov 0   ;;  %s1387_s19 = smov 0  }
   0xa   :  { %s1389_s20 = smov 0   ;;  %s1391_s21 = smov 0  }
   0xb   :  { %s1393_s22 = smov 0   ;;  %s1395_s23 = smov 0  }
   0xc   :  { %s1397_s24 = smov 0   ;;  %s1399_s25 = smov 0  }
   0xd LB: > { %1796 = sst [smem:[#allocation15_spill]] %s1313_s18  ;;  %s1426_s26 = sadd.s32 4294967295, %s1341_s25   ;;  %s1341_s25 = sphi %s1399_s25, %s26_s25   ;;  %s1337_s24 = sphi %s1397_s24, %s1826_s24   ;;  %s1333_s23 = sphi %s1395_s23, %s1820_s23   ;;  %s1329_s22 = sphi %s1393_s22, %s1825_s22   ;;  %s1325_s21 = sphi %s1391_s21, %s1819_s21   ;;  %s1321_s20 = sphi %s1389_s20, %s1824_s20   ;;  %s1317_s19 = sphi %s1387_s19, %s1823_s19   ;;  %s1313_s18 = sphi %s1385_s18, %s1822_s18  }
   0xe   : > { %1797 = sst [smem:[#allocation16_spill]] %s1333_s23  ;;  %s1787_s27 = sadd.s32 4294967294, %s1341_s25  }
   0xf   : > { %p60_p0 = scmp.ne.s32.totalorder %s1317_s19, %s1313_s18  ;;  %p1784_p1 = scmp.eq.s32.totalorder %s1426_s26, 0 }
  0x10   : > { %p134_p3 = scmp.eq.s32.totalorder %s1787_s27, 3  ;;  %p856_p5 = scmp.ge.s32.totalorder %s1341_s25, 1 }
  0x11   : > { %p1437_p4 = por %p1784_p1, %p60_p0  ;;  %p197_p7 = scmp.lt.s32.totalorder %s1341_s25, 5 }
  0x12   : > { %p1442_p6 = por %p134_p3, %p60_p0  ;;  %s1343_s6 = smov [#allocation5]  }
  0x13   : > { %s1798_s28 = scalar_select %p1437_p4, 1, 0 }
  0x14   : > { %s1799_s29 = scalar_select %p1442_p6, 1, 0 }
  0x15   : > { %p1447_p8 = pnand %p856_p5, %p197_p7  ;;  %s209_s7 = sshll.u32 %s1343_s6, 4  ;;  %s210_s7 = int_to_ptr.vmem [resolvable:$true] %s209_s7 }
  0x16   : > { %1800 = sst [smem:[#allocation17_spill]] %s1799_s29  ;;  %s1803_s1 = sld [smem:[#allocation20_spill]] }
  0x17   : > { %s1801_s30 = scalar_select %p1447_p8, 1, 0 }
  0x18   : > { %p1027_p9 = pneg %p1447_p8 }
  0x1a   : > { %p1455_p10 = pnand %p1027_p9, %p1784_p1 }
  0x1c   : > { %s1121_s11 = scalar_lea.hbm %s1803_s1, 6144  ;;  %p1123_p12 = pneg %p1455_p10 }
  0x1d   : > { %p1122_p11 = scmp.ne.s32.totalorder %s1803_s1, %s1121_s11  ;;  %p1128_p3 = scmp.lt.u32.totalorder %s1121_s11, %s1803_s1 }
  0x1f   : > { %p1124_p13 = pnand %p1123_p12, %p1122_p11 }
  0x21   : > { %p1125_p0 = pneg %p1124_p13 }
  0x23   : > { %p1130_p5 = pnand %p1128_p3, %p1125_p0 }
  0x25   : > { %1133 = shalt.err (!%p1130_p5)
}
  0x26   : > { %s1134_s16 = scalar_lea.vmem %s210_s7, 6144  ;;  %p1142_p2 = scmp.lt.s32.totalorder %s210_s7, %s210_s7 }
  0x27   : > { %p1135_p7 = scmp.ne.s32.totalorder %s210_s7, %s1134_s16  ;;  %p1143_p6 = scmp.lt.s32.totalorder %s1134_s16, %s1134_s16 }
  0x29   : > { %p1137_p9 = pnand %p1135_p7, %p1123_p12  ;;  %p1144_p4 = por %p1143_p6, %p1142_p2 }
  0x2b   : > { %p1138_p1 = pneg %p1137_p9 }
  0x2d   : > { %p1145_p8 = pnand %p1144_p4, %p1138_p1 }
  0x2f   : > { %1148 = shalt.err (!%p1145_p8)
}
  0x30   : > { %s1344_s17 = smov 384   ;;  %s1345_s6 = smov 24  }
  0x31   : > { %1030 = dma.hbm_to_vmem [thread:$0]  (!%p1455_p10), %s1803_s1, 6144, %s210_s7, [#allocation6], %s1344_s17, %s1344_s17, %s1345_s6  }
  0x32   : > { %s35_s11 = sadd.s32 1, %s1333_s23  ;;  %s38_s12 = sadd.s32 1, %s1337_s24 }
  0x33   : > { %p36_p1 = scmp.ge.s32.totalorder %s35_s11, 2  ;;  %s47_s13 = sadd.s32 1, %s1321_s20 }
  0x34   : > { %p54_p2 = scmp.ne.s32.totalorder %s1321_s20, %s1317_s19  ;;  %p55_p4 = scmp.eq.s32.totalorder %s1341_s25, 0 }
  0x35   : > { %s1828_s11 = smov (%p36_p1, %s35_s11), 0  ;;  %s1830_s12 = smov (!%p36_p1, %s38_s12), %s1337_s24 }
  0x36   : > { %1804 = sst [smem:[#allocation18_spill]] %s1828_s11  ;;  %s43_s14 = ssub.s32 %s1333_s23, %s1828_s11 }
  0x37   : > { %p40_p6 = scmp.ge.s32.totalorder %s1830_s12, 2  ;;  %p1805_p8 = scmp.eq.s32.totalorder %s1426_s26, 3 }
  0x38   : > { %p1492_p10 = por %p55_p4, %p54_p2  ;;  %p1046_p12 = scmp.lt.s32.totalorder %s1341_s25, 4 }
  0x39   : > { %p1488_p11 = por %p1805_p8, %p54_p2  ;;  %s1832_s12 = smov (%p40_p6, %s1830_s12), 0 }
  0x3a   : > { %1808 = sst [smem:[#allocation19_spill]] %s1832_s12  ;;  %s226_s15 = sand.u32 1, %s1321_s20  }
  0x3b   : > { %s860_s16 = sshll.u32 %s1333_s23, 3  ;;  %s42_s17 = ssub.s32 %s1337_s24, %s1832_s12 }
  0x3c   : > { %s44_s6 = sor.u32 %s43_s14, %s42_s17  ;;  %s859_s9 = sshll.u32 %s226_s15, 6 }
  0x3d   : > { %p45_p13 = scmp.eq.s32.totalorder %s44_s6, 0  ;;  %s861_s10 = sshll.u32 %s1337_s24, 4 }
  0x3e   : > { %s230_s27 = scalar_lea.vmem [#allocation2], %s859_s9  ;;  %s236_s29 = sadd.s32 %s861_s10, %s860_s16 }
  0x3f   : > { %s239_s1 = sshll.u32 %s230_s27, 4  ;;  %s862_s18 = sshll.u32 %s236_s29, 7  ;;  %s1507_s1 = int_to_ptr.vmem [resolvable:$true] %s239_s1 }
  0x40   : > { %s1505_s11 = scalar_select %p45_p13, %s1321_s20, %s47_s13  }
  0x41   : > { %p1513_p0 = pnand %p1046_p12, %p1492_p10  ;;  %s1520_s14 = scalar_lea.hbm %s1778_s0, %s862_s18 }
  0x42   : > { %s1522_s27 = scalar_lea.sflag [#allocation3], %s226_s15  ;;  %s1149_s29 = scalar_lea.hbm %s1520_s14, 1024 }
  0x43   : > { %p1150_p3 = scmp.ne.s32.totalorder %s1520_s14, %s1149_s29  ;;  %p1151_p5 = pneg %p1513_p0 }
  0x44   : > { %s1154_s12 = scalar_lea.hbm %s1778_s0, 4096  ;;  %p1155_p1 = scmp.lt.u32.totalorder %s1520_s14, %s1778_s0 }
  0x45   : > { %p1152_p7 = pnand %p1151_p5, %p1150_p3  ;;  %p1156_p2 = scmp.lt.u32.totalorder %s1154_s12, %s1149_s29 }
  0x46   : > { %p1158_p6 = scmp.lt.u32.totalorder %s1149_s29, %s1520_s14 }
  0x47   : > { %p1153_p9 = pneg %p1152_p7  ;;  %p1157_p4 = por %p1156_p2, %p1155_p1 }
  0x49   : > { %p1159_p8 = por %p1158_p6, %p1157_p4 }
  0x4b   : > { %p1160_p10 = pnand %p1159_p8, %p1153_p9 }
  0x4d   : > { %1163 = shalt.err (!%p1160_p10)
}
  0x4e   : > { %s1164_s15 = scalar_lea.vmem %s1507_s1, 1024  ;;  %s1346_s16 = smov [#allocation2]  }
  0x4f   : > { %p1165_p12 = scmp.ne.s32.totalorder %s1507_s1, %s1164_s15  ;;  %s1169_s17 = sshll.u32 %s1346_s16, 4  ;;  %s1170_s17 = int_to_ptr.vmem [resolvable:$false] %s1169_s17 }
  0x50   : > { %s1171_s6 = scalar_lea.vmem %s1170_s17, 2048  ;;  %p1172_p7 = scmp.lt.s32.totalorder %s1507_s1, %s1170_s17 }
  0x51   : > { %p1167_p13 = pnand %p1165_p12, %p1151_p5  ;;  %p1173_p1 = scmp.lt.s32.totalorder %s1171_s6, %s1164_s15 }
  0x53   : > { %p1168_p3 = pneg %p1167_p13  ;;  %p1174_p2 = por %p1173_p1, %p1172_p7 }
  0x55   : > { %p1175_p4 = pnand %p1174_p2, %p1168_p3 }
  0x57   : > { %1178 = shalt.err (!%p1175_p4)
}
  0x58   : > { %s1347_s9 = smov 128   ;;  %s1348_s10 = smov 8  }
  0x59   : > { %1034 = dma.hbm_to_vmem [thread:$0]  (!%p1513_p0), %s1520_s14, 1024, %s1507_s1, %s1522_s27, %s1347_s9, %s1347_s9, %s1348_s10  }
  0x5a   : > { %p1810_p5 = scmp.ne.s32.totalorder %s1801_s30, 0 }
  0x5b   : > { %s1553_s29 = sand.u32 (!%p1810_p5), 1, %s1317_s19   ;;  %p1811_p9 = scmp.ne.s32.totalorder (!%p1810_p5), %s1798_s28, 0 }
  0x5c   : > { %251 = sbr.rel (%p1810_p5) target bundleno = 442 (0x1ba), region = 32  ;;  %s1556_s13 = sshll.u32 (!%p1810_p5), %s1553_s29, 6 }
  0x5d   : > { %s254_s23 = scalar_lea.sflag (!%p1810_p5), [#allocation3], %s1553_s29  ;;  %s1560_s12 = scalar_lea.vmem (!%p1810_p5), [#allocation2], %s1556_s13 }
  0x63   : > { %1296 = dma.done.wait (%p1811_p9), %s254_s23, 1024  }
  0x64   : > { %1298 = vsyncadd (%p1811_p9), %s254_s23, 4294966272  ;;  %p1812_p0 = scmp.eq.s32.totalorder %s1426_s26, 0 }
  0x66   : > { %1300 = dma.done.wait (%p1812_p0), [#allocation6], 6144   ;;  %p1813_p6 = pmov %p1812_p0 }
  0x67   : > { %v1349_v0 = vmov 0.0   ;;  %v311_v1 = vld [vmem:[#allocation5 + $0x8] sm:$0xff]  ;;  %v314_v2 = vld [vmem:[#allocation5 + $0x20] sm:$0xff]  ;;  %v313_v5 = vld [vmem:[#allocation5 + $0x18] sm:$0xff]  ;;  %s1596_s28 = scalar_lea.vmem [#allocation8], %s1556_s13  ;;  %s1600_s30 = scalar_lea.vmem [#allocation7], %s1556_s13 }
  0x68   : > { %1302 = vsyncadd (%p1813_p6), [#allocation6], 4294961152  ;;  %439 = vmatprep.mubr.f32.mxu0 %v1349_v0  ;;  %v310_v3 = vld [vmem:[#allocation5] sm:$0xff]  ;;  %v951_v4 = vpack.c.bf16 %v314_v2, %v311_v1  ;;  %v317_v6 = vld [vmem:[#allocation5 + $0x38] sm:$0xff]  ;;  %s1609_s14 = scalar_lea.vmem [#allocation10], %s1556_s13  ;;  %s872_s27 = sshll.u32 %s1325_s21, 3 }
  0x69   : > { %v320_v7 = vld [vmem:[#allocation5 + $0x50] sm:$0xff]  ;;  %v953_v8 = vpack.c.bf16 %v313_v5, %v310_v3  ;;  %v319_v11 = vld [vmem:[#allocation5 + $0x48] sm:$0xff]  ;;  %v326_v13 = vld [vmem:[#allocation5 + $0x80] sm:$0xff]  ;;  %s873_s18 = sshll.u32 %s1329_s22, 4  ;;  %s651_s7 = sshll.u32 %s1600_s30, 4  ;;  %s1641_s7 = int_to_ptr.vmem [resolvable:$true] %s651_s7 }
  0x6a   : > { %v955_v9 = vpack.c.bf16 %v320_v7, %v317_v6  ;;  %v316_v10 = vld [vmem:[#allocation5 + $0x30] sm:$0xff]  ;;  %v323_v12 = vld [vmem:[#allocation5 + $0x68] sm:$0xff]  ;;  %952 = vmatprep.subr.bf16.mxu0 %v951_v4  ;;  %v322_v16 = vld [vmem:[#allocation5 + $0x60] sm:$0xff]  ;;  %s648_s15 = sadd.s32 %s873_s18, %s872_s27  ;;  %s669_s16 = sshll.u32 %s1596_s28, 4  ;;  %s1643_s16 = int_to_ptr.vmem [resolvable:$true] %s669_s16 }
  0x6b   : > { %954 = vmatpush1.bf16.msra.mxu0 %v953_v8  ;;  %v957_v14 = vpack.c.bf16 %v319_v11, %v316_v10  ;;  %v959_v15 = vpack.c.bf16 %v326_v13, %v323_v12  ;;  %v325_v17 = vld [vmem:[#allocation5 + $0x78] sm:$0xff]  ;;  %v332_v19 = vld [vmem:[#allocation5 + $0xb0] sm:$0xff]  ;;  %v315_v21 = vld [vmem:[#allocation5 + $0x28] sm:$0xff]  ;;  %s630_s21 = sand.u32 1, %s1426_s26   ;;  %s874_s22 = sshll.u32 %s648_s15, 7 }
  0x6c   : > { %956 = vmatprep.subr.bf16.mxu0 %v955_v9  ;;  %v329_v18 = vld [vmem:[#allocation5 + $0x98] sm:$0xff]  ;;  %v312_v20 = vld [vmem:[#allocation5 + $0x10] sm:$0xff]  ;;  %v961_v23 = vpack.c.bf16 %v325_v17, %v322_v16  ;;  %v318_v24 = vld [vmem:[#allocation5 + $0x40] sm:$0xff]  ;;  %s687_s17 = sshll.u32 %s1609_s14, 4  ;;  %s1653_s9 = scalar_lea.hbm %s1782_s4, %s874_s22  ;;  %s1660_s17 = int_to_ptr.vmem [resolvable:$true] %s687_s17 }
  0x6d   : > { %v983_v22 = vpack.c.bf16 %v315_v21, %v312_v20  ;;  %v321_v25 = vld [vmem:[#allocation5 + $0x58] sm:$0xff]  ;;  %v963_v26 = vpack.c.bf16 %v332_v19, %v329_v18  ;;  %v328_v27 = vld [vmem:[#allocation5 + $0x90] sm:$0xff]  ;;  %v331_v28 = vld [vmem:[#allocation5 + $0xa8] sm:$0xff]  ;;  %v360_v18 = vlaneseq  ;;  %s1658_s23 = scalar_lea.hbm %s1781_s3, %s874_s22  ;;  %s1814_s5 = sld [smem:[#allocation21_spill]] }
  0x6e   : > { %v335_v29 = vld [vmem:[#allocation5 + $0xc8] sm:$0xff]  ;;  %v987_v30 = vpack.c.bf16 %v321_v25, %v318_v24  ;;  %v338_v31 = vld [vmem:[#allocation5 + $0xe0] sm:$0xff]  ;;  %v324_v32 = vld [vmem:[#allocation5 + $0x70] sm:$0xff]  ;;  %v965_v35 = vpack.c.bf16 %v331_v28, %v328_v27  ;;  %s1669_s27 = scalar_lea.sflag [#allocation9], %s630_s21  ;;  %s1179_s18 = scalar_lea.vmem %s1643_s16, 1024 }
  0x6f   : > { %958 = vmatpush1.bf16.msra.mxu0 %v957_v14  ;;  %984 = vmatprep.subr.bf16.mxu1 %v983_v22  ;;  %v327_v33 = vld [vmem:[#allocation5 + $0x88] sm:$0xff]  ;;  %v330_v36 = vld [vmem:[#allocation5 + $0xa0] sm:$0xff]  ;;  %v333_v37 = vld [vmem:[#allocation5 + $0xb8] sm:$0xff]  ;;  %v967_v38 = vpack.c.bf16 %v338_v31, %v335_v29  ;;  %v361_v19 = vshrl.u32 %v360_v18, 7  ;;  %p1180_p8 = scmp.ne.s32.totalorder %s1643_s16, %s1179_s18  ;;  %s1350_s15 = smov [#allocation8]  }
  0x70   : > { %960 = vmatprep.subr.bf16.mxu0 %v959_v15  ;;  %986 = vmatpush3.bf16.msra.mxu1 %v983_v22  ;;  %v991_v34 = vpack.c.bf16 %v327_v33, %v324_v32  ;;  %v334_v39 = vld [vmem:[#allocation5 + $0xc0] sm:$0xff]  ;;  %v337_v40 = vld [vmem:[#allocation5 + $0xd8] sm:$0xff]  ;;  %v344_v43 = vld [vmem:[#allocation5 + $0x110] sm:$0xff]  ;;  %v995_v44 = vpack.c.bf16 %v333_v37, %v330_v36  ;;  %s1183_s26 = sshll.u32 %s1350_s15, 4  ;;  %s1184_s26 = int_to_ptr.vmem [resolvable:$false] %s1183_s26 }
  0x71   : > { %988 = vmatprep.subr.bf16.mxu1 %v987_v30  ;;  %v302_v41 = vld [vmem:[%s1560_s12] sm:$0xff]  ;;  %v341_v42 = vld [vmem:[#allocation5 + $0xf8] sm:$0xff]  ;;  %v969_v45 = vpack.c.bf16 %v337_v40, %v334_v39  ;;  %v336_v46 = vld [vmem:[#allocation5 + $0xd0] sm:$0xff]  ;;  %v362_v20 = vsub.s32 0, %v361_v19  ;;  %v366_v22 = vsub.s32 1, %v361_v19  ;;  %v370_v25 = vsub.s32 2, %v361_v19  ;;  %p1181_p10 = pnand %p1180_p8, %p1488_p11  ;;  %p1186_p13 = scmp.lt.s32.totalorder %s1643_s16, %s1184_s26 }
  0x72   : > { %939 = vmatprep.mubr.f32.mxu1 %v302_v41  ;;  %v339_v47 = vld [vmem:[#allocation5 + $0xe8] sm:$0xff]  ;;  %v971_v48 = vpack.c.bf16 %v344_v43, %v341_v42  ;;  %v340_v49 = vld [vmem:[#allocation5 + $0xf0] sm:$0xff]  ;;  %v350_v52 = vld [vmem:[#allocation5 + $0x140] sm:$0xff]  ;;  %s1185_s6 = scalar_lea.vmem %s1184_s26, 2048 }
  0x73   : > { %962 = vmatpush1.bf16.msra.mxu0 %v961_v23  ;;  %v343_v50 = vld [vmem:[#allocation5 + $0x108] sm:$0xff]  ;;  %v999_v53 = vpack.c.bf16 %v339_v47, %v336_v46  ;;  %v342_v55 = vld [vmem:[#allocation5 + $0x100] sm:$0xff]  ;;  %v345_v56 = vld [vmem:[#allocation5 + $0x118] sm:$0xff]  ;;  %p1182_p12 = pneg %p1181_p10  ;;  %p1187_p3 = scmp.lt.s32.totalorder %s1185_s6, %s1179_s18 }
  0x74   : > { %964 = vmatprep.subr.bf16.mxu0 %v963_v26  ;;  %990 = vmatpush3.bf16.msra.mxu1 %v987_v30  ;;  %v347_v51 = vld [vmem:[#allocation5 + $0x128] sm:$0xff]  ;;  %v973_v54 = vpack.c.bf16 %v343_v50, %v340_v49  ;;  %v346_v58 = vld [vmem:[#allocation5 + $0x120] sm:$0xff]  ;;  %v349_v59 = vld [vmem:[#allocation5 + $0x138] sm:$0xff]  ;;  %v1003_v62 = vpack.c.bf16 %v345_v56, %v342_v55 }
  0x75   : > { %992 = vmatprep.subr.bf16.mxu1 %v991_v34  ;;  %v975_v57 = vpack.c.bf16 %v350_v52, %v347_v51  ;;  %v353_v60 = vld [vmem:[#allocation5 + $0x158] sm:$0xff]  ;;  %v356_v61 = vld [vmem:[#allocation5 + $0x170] sm:$0xff]  ;;  %v977_v63 = vpack.c.bf16 %v349_v59, %v346_v58  ;;  %v351_v2 = vld [vmem:[#allocation5 + $0x148] sm:$0xff]  ;;  %p1188_p7 = por %p1187_p3, %p1186_p13 }
  0x76   : > { %v348_v1 = vld [vmem:[#allocation5 + $0x130] sm:$0xff]  ;;  %v979_v3 = vpack.c.bf16 %v356_v61, %v353_v60  ;;  %v355_v5 = vld [vmem:[#allocation5 + $0x168] sm:$0xff]  ;;  %v354_v8 = vld [vmem:[#allocation5 + $0x160] sm:$0xff] }
  0x77   : > { %966 = vmatpush1.bf16.msra.mxu0 %v965_v35  ;;  %v352_v4 = vld [vmem:[#allocation5 + $0x150] sm:$0xff]  ;;  %v1007_v6 = vpack.c.bf16 %v351_v2, %v348_v1  ;;  %v357_v9 = vld [vmem:[#allocation5 + $0x178] sm:$0xff]  ;;  %v303_v11 = vld [vmem:[%s1560_s12 + $0x8] sm:$0xff]  ;;  %p1189_p1 = pnand %p1188_p7, %p1182_p12 }
  0x78   : > { %968 = vmatprep.subr.bf16.mxu0 %v967_v38  ;;  %994 = vmatpush3.bf16.msra.mxu1 %v991_v34  ;;  %v981_v7 = vpack.c.bf16 %v355_v5, %v352_v4  ;;  %v1011_v10 = vpack.c.bf16 %v357_v9, %v354_v8  ;;  %v304_v12 = vld [vmem:[%s1560_s12 + $0x10] sm:$0xff]  ;;  %v305_v13 = vld [vmem:[%s1560_s12 + $0x18] sm:$0xff]  ;;  %v306_v14 = vld [vmem:[%s1560_s12 + $0x20] sm:$0xff] }
  0x79   : > { %996 = vmatprep.subr.bf16.mxu1 %v995_v44  ;;  %v307_v15 = vld [vmem:[%s1560_s12 + $0x28] sm:$0xff]  ;;  %v308_v16 = vld [vmem:[%s1560_s12 + $0x30] sm:$0xff]  ;;  %v309_v17 = vld [vmem:[%s1560_s12 + $0x38] sm:$0xff] }
  0x7a   : > { %v358_v21 = vld [vmem:[%s1780_s2] sm:$0x7] }
  0x7b   : > { %970 = vmatpush1.bf16.msra.mxu0 %v969_v45  ;;  %v1589_v23 = vrot.slane %v358_v21, %v362_v20  ;;  %v1591_v24 = vrot.slane %v358_v21, %v366_v22  ;;  %v371_v30 = vrot.slane %v358_v21, %v370_v25 }
  0x7c   : > { %972 = vmatprep.subr.bf16.mxu0 %v971_v48  ;;  %998 = vmatpush3.bf16.msra.mxu1 %v995_v44 }
  0x7d   : > { %1000 = vmatprep.subr.bf16.mxu1 %v999_v53 }
  0x7f   : > { %974 = vmatpush1.bf16.msra.mxu0 %v973_v54 }
  0x80   : > { %976 = vmatprep.subr.bf16.mxu0 %v975_v57  ;;  %1002 = vmatpush3.bf16.msra.mxu1 %v999_v53 }
  0x81   : > { %1004 = vmatprep.subr.bf16.mxu1 %v1003_v62 }
  0x83   : > { %978 = vmatpush1.bf16.msra.mxu0 %v977_v63 }
  0x84   : > { %980 = vmatprep.subr.bf16.mxu0 %v979_v3  ;;  %1006 = vmatpush3.bf16.msra.mxu1 %v1003_v62 }
  0x85   : > { %1008 = vmatprep.subr.bf16.mxu1 %v1007_v6 }
  0x87   : > { %982 = vmatpush1.bf16.msra.mxu0 %v981_v7 }
  0x88   : > { %1010 = vmatpush3.bf16.msra.mxu1 %v1007_v6 }
  0x89   : > { %1012 = vmatprep.subr.bf16.mxu1 %v1011_v10 }
  0x8a   : > { %440 = vmatmul.mubr.f32.vlgmr.msra.gmra.mrb[0].mxu0 %v302_v41 }
  0x8b   : > { %445 = vmatprep.mubr.f32.mxu0 %v1349_v0 }
  0x8c   : > { %1014 = vmatpush3.bf16.msra.mxu1 %v1011_v10 }
  0x8e   : > { %446 = vmatmul.mubr.f32.gmra.mrb[2].mxu0 %v303_v11 }
  0x8f   : > { %451 = vmatprep.mubr.f32.mxu0 %v1349_v0  ;;  %940 = vmatmul.mubr.f32.vlgmr.msra.gmra.mrb[0].mxu1 %v303_v11 }
  0x90   : > { %942 = vmatprep.mubr.f32.mxu1 %v304_v12 }
  0x92   : > { %452 = vmatmul.mubr.f32.gmra.mrb[4].mxu0 %v304_v12 }
  0x93   : > { %457 = vmatprep.mubr.f32.mxu0 %v1349_v0  ;;  %943 = vmatmul.mubr.f32.gmra.mrb[2].mxu1 %v305_v13 }
  0x94   : > { %945 = vmatprep.mubr.f32.mxu1 %v306_v14 }
  0x96   : > { %458 = vmatmul.mubr.f32.gmra.mrb[6].mxu0 %v305_v13 }
  0x97   : > { %463 = vmatprep.mubr.f32.mxu0 %v1349_v0  ;;  %946 = vmatmul.mubr.f32.gmra.mrb[4].mxu1 %v307_v15 }
  0x98   : > { %948 = vmatprep.mubr.f32.mxu1 %v308_v16 }
  0x9a   : > { %464 = vmatmul.mubr.f32.gmra.mrb[8].mxu0 %v306_v14 }
  0x9b   : > { %469 = vmatprep.mubr.f32.mxu0 %v1349_v0  ;;  %949 = vmatmul.mubr.f32.gmra.mrb[6].mxu1 %v309_v17 }
  0x9e   : > { %470 = vmatmul.mubr.f32.gmra.mrb[10].mxu0 %v307_v15 }
  0x9f   : > { %475 = vmatprep.mubr.f32.mxu0 %v1349_v0 }
  0xa2   : > { %476 = vmatmul.mubr.f32.gmra.mrb[12].mxu0 %v308_v16 }
  0xa3   : > { %481 = vmatprep.mubr.f32.mxu0 %v1349_v0 }
  0xa6   : > { %482 = vmatmul.mubr.f32.gmra.mrb[14].mxu0 %v309_v17 }
 0x15d   : > { %v441_v26 = vpop.f32.mrb[0].mxu0 }
 0x15e   : > { %v442_v27 = vadd.f32 %v441_v26, %v1589_v23  ;;  %v443_v0 = vpop.f32.mrb[1].mxu0 }
 0x15f   : > { %v444_v28 = vadd.f32 %v443_v0, %v1591_v24 }
 0x160   : > { %v593_v29 = vmul.f32 0.17677669, %v442_v27 }
 0x161   : > { %609 = vst [vmem:[%s1596_s28] sm:$0xff] %v444_v28  ;;  %v447_v31 = vpop.f32.mrb[2].mxu0 }
 0x162   : > { %601 = vst [vmem:[%s1600_s30] sm:$0xff] %v593_v29  ;;  %v448_v32 = vadd.f32 %v447_v31, %v1589_v23  ;;  %v449_v33 = vpop.f32.mrb[3].mxu0  ;;  %v941_v35 = vpop.f32.mrb[0].mxu1 }
 0x163   : > { %v450_v34 = vadd.f32 %v449_v33, %v1591_v24  ;;  %v560_v37 = vadd.f32 %v941_v35, %v371_v30  ;;  %v554_v38 = vpop.f32.mrb[1].mxu1 }
 0x164   : > { %v594_v36 = vmul.f32 0.17677669, %v448_v32  ;;  %v555_v40 = vadd.f32 %v554_v38, %v371_v30 }
 0x165   : > { %610 = vst [vmem:[%s1596_s28 + $0x8] sm:$0xff] %v450_v34  ;;  %v453_v39 = vpop.f32.mrb[4].mxu0  ;;  %618 = vst [vmem:[%s1609_s14 + $0x8] sm:$0xff] %v560_v37 }
 0x166   : > { %602 = vst [vmem:[%s1600_s30 + $0x8] sm:$0xff] %v594_v36  ;;  %v454_v41 = vadd.f32 %v453_v39, %v1589_v23  ;;  %v455_v42 = vpop.f32.mrb[5].mxu0  ;;  %617 = vst [vmem:[%s1609_s14] sm:$0xff] %v555_v40  ;;  %v944_v44 = vpop.f32.mrb[2].mxu1 }
 0x167   : > { %v456_v43 = vadd.f32 %v455_v42, %v1591_v24  ;;  %v570_v46 = vadd.f32 %v944_v44, %v371_v30  ;;  %v564_v47 = vpop.f32.mrb[3].mxu1 }
 0x168   : > { %v595_v45 = vmul.f32 0.17677669, %v454_v41  ;;  %v565_v49 = vadd.f32 %v564_v47, %v371_v30 }
 0x169   : > { %611 = vst [vmem:[%s1596_s28 + $0x10] sm:$0xff] %v456_v43  ;;  %v459_v48 = vpop.f32.mrb[6].mxu0  ;;  %620 = vst [vmem:[%s1609_s14 + $0x18] sm:$0xff] %v570_v46 }
 0x16a   : > { %603 = vst [vmem:[%s1600_s30 + $0x10] sm:$0xff] %v595_v45  ;;  %v460_v50 = vadd.f32 %v459_v48, %v1589_v23  ;;  %v461_v51 = vpop.f32.mrb[7].mxu0  ;;  %619 = vst [vmem:[%s1609_s14 + $0x10] sm:$0xff] %v565_v49  ;;  %v947_v53 = vpop.f32.mrb[4].mxu1 }
 0x16b   : > { %v462_v52 = vadd.f32 %v461_v51, %v1591_v24  ;;  %v580_v55 = vadd.f32 %v947_v53, %v371_v30  ;;  %v574_v56 = vpop.f32.mrb[5].mxu1 }
 0x16c   : > { %v596_v54 = vmul.f32 0.17677669, %v460_v50  ;;  %v575_v58 = vadd.f32 %v574_v56, %v371_v30 }
 0x16d   : > { %612 = vst [vmem:[%s1596_s28 + $0x18] sm:$0xff] %v462_v52  ;;  %v465_v57 = vpop.f32.mrb[8].mxu0  ;;  %622 = vst [vmem:[%s1609_s14 + $0x28] sm:$0xff] %v580_v55 }
 0x16e   : > { %604 = vst [vmem:[%s1600_s30 + $0x18] sm:$0xff] %v596_v54  ;;  %v466_v59 = vadd.f32 %v465_v57, %v1589_v23  ;;  %v467_v60 = vpop.f32.mrb[9].mxu0  ;;  %621 = vst [vmem:[%s1609_s14 + $0x20] sm:$0xff] %v575_v58  ;;  %v950_v62 = vpop.f32.mrb[6].mxu1 }
 0x16f   : > { %v468_v61 = vadd.f32 %v467_v60, %v1591_v24  ;;  %v590_v1 = vadd.f32 %v950_v62, %v371_v30  ;;  %v584_v2 = vpop.f32.mrb[7].mxu1 }
 0x170   : > { %v597_v63 = vmul.f32 0.17677669, %v466_v59  ;;  %v585_v4 = vadd.f32 %v584_v2, %v371_v30 }
 0x171   : > { %613 = vst [vmem:[%s1596_s28 + $0x20] sm:$0xff] %v468_v61  ;;  %v471_v3 = vpop.f32.mrb[10].mxu0  ;;  %624 = vst [vmem:[%s1609_s14 + $0x38] sm:$0xff] %v590_v1 }
 0x172   : > { %605 = vst [vmem:[%s1600_s30 + $0x20] sm:$0xff] %v597_v63  ;;  %v472_v5 = vadd.f32 %v471_v3, %v1589_v23  ;;  %v473_v6 = vpop.f32.mrb[11].mxu0  ;;  %623 = vst [vmem:[%s1609_s14 + $0x30] sm:$0xff] %v585_v4  ;;  %s1666_s14 = scalar_lea.hbm %s1814_s5, %s874_s22 }
 0x173   : > { %v474_v7 = vadd.f32 %v473_v6, %v1591_v24 }
 0x174   : > { %v598_v8 = vmul.f32 0.17677669, %v472_v5 }
 0x175   : > { %614 = vst [vmem:[%s1596_s28 + $0x28] sm:$0xff] %v474_v7  ;;  %v477_v9 = vpop.f32.mrb[12].mxu0 }
 0x176   : > { %606 = vst [vmem:[%s1600_s30 + $0x28] sm:$0xff] %v598_v8  ;;  %v478_v10 = vadd.f32 %v477_v9, %v1589_v23  ;;  %v479_v11 = vpop.f32.mrb[13].mxu0 }
 0x177   : > { %v480_v12 = vadd.f32 %v479_v11, %v1591_v24 }
 0x178   : > { %v599_v13 = vmul.f32 0.17677669, %v478_v10 }
 0x179   : > { %615 = vst [vmem:[%s1596_s28 + $0x30] sm:$0xff] %v480_v12  ;;  %v483_v14 = vpop.f32.mrb[14].mxu0 }
 0x17a   : > { %607 = vst [vmem:[%s1600_s30 + $0x30] sm:$0xff] %v599_v13  ;;  %v484_v15 = vadd.f32 %v483_v14, %v1589_v23  ;;  %v485_v16 = vpop.f32.mrb[15].mxu0 }
 0x17b   : > { %v486_v17 = vadd.f32 %v485_v16, %v1591_v24 }
 0x17c   : > { %v600_v18 = vmul.f32 0.17677669, %v484_v15 }
 0x17d   : > { %616 = vst [vmem:[%s1596_s28 + $0x38] sm:$0xff] %v486_v17 }
 0x17e   : > { %608 = vst [vmem:[%s1600_s30 + $0x38] sm:$0xff] %v600_v18 }
 0x17f   : > { %1192 = shalt.err (!%p1189_p1)
}
 0x180   : > { %s1193_s28 = scalar_lea.hbm %s1653_s9, 1024  ;;  %s1197_s22 = scalar_lea.hbm %s1782_s4, 4096 }
 0x181   : > { %p1194_p2 = scmp.ne.s32.totalorder %s1653_s9, %s1193_s28  ;;  %p1198_p9 = scmp.lt.u32.totalorder %s1653_s9, %s1782_s4 }
 0x182   : > { %p1199_p0 = scmp.lt.u32.totalorder %s1197_s22, %s1193_s28  ;;  %p1201_p8 = scmp.lt.u32.totalorder %s1193_s28, %s1653_s9 }
 0x183   : > { %p1195_p4 = pnand %p1194_p2, %p1488_p11 }
 0x184   : > { %p1200_p6 = por %p1199_p0, %p1198_p9 }
 0x185   : > { %p1196_p5 = pneg %p1195_p4 }
 0x186   : > { %p1202_p10 = por %p1201_p8, %p1200_p6 }
 0x188   : > { %p1203_p12 = pnand %p1202_p10, %p1196_p5 }
 0x18a   : > { %1206 = shalt.err (!%p1203_p12)
}
 0x18b   : > { %s1351_s12 = smov 128   ;;  %s1352_s1 = smov 8  }
 0x18c   : > { %1022 = dma.vmem_to_hbm [thread:$0]  (%p1488_p11), %s1643_s16, 1024, %s1653_s9, %s1669_s27, %s1351_s12, %s1351_s12, %s1352_s1  }
 0x18d   : > { %s626_s18 = scalar_lea.sflag [#allocation4], %s1553_s29  ;;  %s1207_s15 = scalar_lea.vmem %s1641_s7, 1024 }
 0x18e   : > { %p1208_p13 = scmp.ne.s32.totalorder %s1641_s7, %s1207_s15  ;;  %s1353_s26 = smov [#allocation7]  }
 0x18f   : > { %s1211_s6 = sshll.u32 %s1353_s26, 4  ;;  %s1212_s6 = int_to_ptr.vmem [resolvable:$false] %s1211_s6 }
 0x190   : > { %p1209_p3 = pnand %p1208_p13, %p1488_p11  ;;  %s1213_s28 = scalar_lea.vmem %s1212_s6, 2048 }
 0x191   : > { %p1214_p1 = scmp.lt.s32.totalorder %s1641_s7, %s1212_s6  ;;  %p1215_p2 = scmp.lt.s32.totalorder %s1213_s28, %s1207_s15 }
 0x192   : > { %p1210_p7 = pneg %p1209_p3 }
 0x193   : > { %p1216_p4 = por %p1215_p2, %p1214_p1 }
 0x195   : > { %p1217_p5 = pnand %p1216_p4, %p1210_p7 }
 0x197   : > { %1220 = shalt.err (!%p1217_p5)
}
 0x198   : > { %s1221_s16 = scalar_lea.hbm %s1658_s23, 1024  ;;  %s1225_s21 = scalar_lea.hbm %s1781_s3, 4096 }
 0x199   : > { %p1222_p9 = scmp.ne.s32.totalorder %s1658_s23, %s1221_s16  ;;  %p1226_p8 = scmp.lt.u32.totalorder %s1658_s23, %s1781_s3 }
 0x19a   : > { %p1227_p10 = scmp.lt.u32.totalorder %s1225_s21, %s1221_s16  ;;  %p1229_p13 = scmp.lt.u32.totalorder %s1221_s16, %s1658_s23 }
 0x19b   : > { %p1223_p0 = pnand %p1222_p9, %p1488_p11 }
 0x19c   : > { %p1228_p12 = por %p1227_p10, %p1226_p8 }
 0x19d   : > { %p1224_p6 = pneg %p1223_p0 }
 0x19e   : > { %p1230_p3 = por %p1229_p13, %p1228_p12 }
 0x1a0   : > { %p1231_p7 = pnand %p1230_p3, %p1224_p6 }
 0x1a2   : > { %1234 = shalt.err (!%p1231_p7)
}
 0x1a3   : > { %1021 = dma.vmem_to_hbm [thread:$0]  (%p1488_p11), %s1641_s7, 1024, %s1658_s23, %s626_s18, %s1351_s12, %s1351_s12, %s1352_s1  }
 0x1a4   : > { %s1235_s13 = scalar_lea.vmem %s1660_s17, 1024  ;;  %s1354_s15 = smov [#allocation10]  }
 0x1a5   : > { %p1236_p1 = scmp.ne.s32.totalorder %s1660_s17, %s1235_s13  ;;  %s1239_s26 = sshll.u32 %s1354_s15, 4  ;;  %s1240_s26 = int_to_ptr.vmem [resolvable:$false] %s1239_s26 }
 0x1a6   : > { %s1241_s6 = scalar_lea.vmem %s1240_s26, 2048  ;;  %p1242_p5 = scmp.lt.s32.totalorder %s1660_s17, %s1240_s26 }
 0x1a7   : > { %p1237_p2 = pnand %p1236_p1, %p1488_p11  ;;  %p1243_p9 = scmp.lt.s32.totalorder %s1241_s6, %s1235_s13 }
 0x1a9   : > { %p1238_p4 = pneg %p1237_p2  ;;  %p1244_p0 = por %p1243_p9, %p1242_p5 }
 0x1ab   : > { %p1245_p6 = pnand %p1244_p0, %p1238_p4 }
 0x1ad   : > { %1248 = shalt.err (!%p1245_p6)
}
 0x1ae   : > { %s1249_s29 = scalar_lea.hbm %s1666_s14, 1024  ;;  %s1253_s18 = scalar_lea.hbm %s1814_s5, 4096 }
 0x1af   : > { %p1250_p8 = scmp.ne.s32.totalorder %s1666_s14, %s1249_s29  ;;  %p1254_p13 = scmp.lt.u32.totalorder %s1666_s14, %s1814_s5 }
 0x1b0   : > { %p1255_p3 = scmp.lt.u32.totalorder %s1253_s18, %s1249_s29  ;;  %p1257_p1 = scmp.lt.u32.totalorder %s1249_s29, %s1666_s14 }
 0x1b1   : > { %p1251_p10 = pnand %p1250_p8, %p1488_p11 }
 0x1b2   : > { %p1256_p7 = por %p1255_p3, %p1254_p13 }
 0x1b3   : > { %p1252_p12 = pneg %p1251_p10 }
 0x1b4   : > { %p1258_p2 = por %p1257_p1, %p1256_p7 }
 0x1b6   : > { %p1259_p4 = pnand %p1258_p2, %p1252_p12 }
 0x1b8   : > { %1262 = shalt.err (!%p1259_p4)
}
 0x1b9   : > { %1023 = dma.vmem_to_hbm [thread:$0]  (%p1488_p11), %s1660_s17, 1024, %s1666_s14, %s1669_s27, %s1351_s12, %s1351_s12, %s1352_s1  }
 0x1ba PF: > { %s1815_s9 = sld [smem:[#allocation15_spill]]  ;;  %s1816_s30 = sld [smem:[#allocation17_spill]] }
 0x1bb   : > { %p1048_p5 = scmp.ge.s32.totalorder %s1341_s25, 2 }
 0x1c0   : > { %s702_s21 = sand.u32 1, %s1815_s9   ;;  %p1817_p9 = scmp.ne.s32.totalorder %s1816_s30, 0 }
 0x1c1   : > { %s703_s22 = scalar_lea.sflag [#allocation4], %s702_s21 }
 0x1c2   : > { %p1036_p0 = pnand %p1048_p5, %p1817_p9 }
 0x1c4   : > { %1304 = dma.done.wait (!%p1036_p0), %s703_s22, 1024  }
 0x1c5   : > { %1306 = vsyncadd (!%p1036_p0), %s703_s22, 4294966272  ;;  %s1818_s8 = sadd.s32 4294967294, %s1341_s25  }
 0x1c6   : > { %s711_s10 = sand.u32 1, %s1818_s8  }
 0x1c7   : > { %s712_s13 = scalar_lea.sflag [#allocation9], %s711_s10 }
 0x1c8   : > { %1308 = dma.done.wait (!%p1036_p0), %s712_s13, 2048  }
 0x1c9   : > { %1310 = vsyncadd (!%p1036_p0), %s712_s13, 4294965248  ;;  %s26_s25 = sadd.s32 1, %s1341_s25   ;;  %s1819_s21 = sld [smem:[#allocation16_spill]] }
 0x1ca   : > { %p23_p11 = scmp.ge.s32.totalorder %s26_s25, 6   ;;  %s1820_s23 = sld [smem:[#allocation18_spill]] }
 0x1cb   : > { %s1821_s17 = sld [smem:[#allocation19_spill]]  ;;  %s1822_s18 = smov %s1317_s19 }
 0x1cc   : > { %s1823_s19 = smov %s1321_s20  ;;  %s1824_s20 = smov %s1505_s11 }
 0x1cd   : > { %s1825_s22 = smov %s1337_s24  ;;  %25 = sbr.rel (!%p23_p11) target bundleno = 13 (0xd), region = 113 }
 0x1d1   : > { %s1826_s24 = smov %s1821_s17 }
 0x1d4   :  { %726 = vsyncpa [#allocation3], 1 }
 0x1d5   :  { %728 = vsyncpa [#allocation3 + $0x1], 1 }
 0x1d6   :  { %729 = vsyncpa [#allocation6], 1 }
 0x1d7   :  { %730 = vsyncpa [#allocation4], 1 }
 0x1d8   :  { %732 = vsyncpa [#allocation4 + $0x1], 1 }
 0x1d9   :  { %733 = vsyncpa [#allocation9], 1 }
 0x1da   :  { %735 = vsyncpa [#allocation9 + $0x1], 1 }

</bundles_post_ra>
